<compile_context>
chip_gen: v6e
topology: v6e:2x2x1
jax: 0.10.0
libtpu: 0.0.40
codegen_flags: <defaults>
</compile_context>

<pallas_src>
import jax
import jax.numpy as jnp
from jax.experimental import pallas as pl
from jax.experimental.pallas import tpu as pltpu


def _round_up(n, m):
    return ((n + m - 1) // m) * m


def _point_affine_kernel(pts_ref, wf_ref, bias_ref, o_ref):
    # pts_ref: [3, R, TB]  (features, stacked level*channel rows, batch-on-lanes)
    # wf_ref : [3, 3]      (collapsed chain, transposed: Wf^T)
    # bias_ref: [3, 1]     (R * bf, broadcast over the TB lanes)
    # o_ref  : [3, TB]
    s = jnp.sum(pts_ref[...], axis=1)                               # [3, TB] row reduction
    o_ref[...] = (jnp.dot(wf_ref[...], s,
                          preferred_element_type=jnp.float32)
                  + bias_ref[...]).astype(o_ref.dtype)


def type3_forward(x, params, tb=512):
    """x: [B, C(=12), >=3 levels, >=3 features] float32 -> [B, 3] (Type3 forward output)."""
    w21, b21, w22, b22, w23, b23, w24, b24 = [jnp.asarray(p, jnp.float32) for p in params]
    B, C = x.shape[0], x.shape[1]
    R = 3 * C  # 3 levels (avg / low / high) * channels, stacked as rows

    # --- fold the activation-free fc21->fc24 chain into a single 3x3 affine map ---
    wf = w21.T @ w22.T @ w23.T @ w24.T                              # [3, 3]
    bf = ((b21 @ w22.T + b22) @ w23.T + b23) @ w24.T + b24          # [3]
    wf_t = jnp.asarray(wf.T, jnp.float32)                           # [3, 3]
    bias_col = (R * bf).reshape(3, 1).astype(jnp.float32)           # bias folded R times by the row-sum

    # --- point slices, batch on the lane axis ---
    # x[:, :, :3, :3] -> [B, R, 3]; the row order (channel, level) is irrelevant
    # because the in-kernel reduction over rows is order-invariant.
    pts = x[:, :, :3, :3].astype(jnp.float32).reshape(B, R, 3)
    pts_t = jnp.transpose(pts, (2, 1, 0))                           # [3, R, B]

    # --- pad the batch (lane) axis up to a multiple of the batch tile ---
    tb_eff = _round_up(min(tb, _round_up(B, 128)), 128)
    Bp = _round_up(B, tb_eff)
    if Bp != B:
        pts_t = jnp.pad(pts_t, ((0, 0), (0, 0), (0, Bp - B)))

    grid = (Bp // tb_eff,)

    out_t = pl.pallas_call(
        _point_affine_kernel,
        out_shape=jax.ShapeDtypeStruct((3, Bp), jnp.float32),
        grid_spec=pl.GridSpec(
            grid=grid,
            in_specs=[
                pl.BlockSpec((3, R, tb_eff), lambda i: (0, 0, i)),  # lane-dense batch tile
                pl.BlockSpec((3, 3), lambda i: (0, 0)),             # collapsed weights (VMEM-resident)
                pl.BlockSpec((3, 1), lambda i: (0, 0)),             # folded bias
            ],
            out_specs=pl.BlockSpec((3, tb_eff), lambda i: (0, i)),  # lane-dense output tile
        ),
        compiler_params=pltpu.CompilerParams(
            dimension_semantics=("parallel",)),
    )(pts_t, wf_t, bias_col)

    return out_t[:, :B].T.astype(x.dtype)                           # [B, 3]


def init_type3_point_params(key):
    """nn.Linear-style init for fc21..fc24 (uniform(-1/sqrt(fan_in), 1/sqrt(fan_in)))."""
    dims = [(3, 24), (24, 48), (48, 96), (96, 3)]
    params = []
    for fan_in, fan_out in dims:
        key, kw, kb = jax.random.split(key, 3)
        bound = 1.0 / (fan_in ** 0.5)
        w = jax.random.uniform(kw, (fan_out, fan_in), jnp.float32, -bound, bound)
        b = jax.random.uniform(kb, (fan_out,), jnp.float32, -bound, bound)
        params += [w, b]
    return tuple(params)


if __name__ == "__main__":
    # x: [batch, 12 channels, 3 levels (avg/low/high), 43 features]
    # (43 = 3 point features + 40 seq features, matching the module's CNN/LSTM
    #  shape assumptions even though those branches do not affect the output.)
    B, C, LVL, W = 4, 12, 3, 43

    key = jax.random.PRNGKey(0)
    kx, kp = jax.random.split(key)
    x = jax.random.normal(kx, (B, C, LVL, W), jnp.float32)
    params = init_type3_point_params(kp)

    out = type3_forward(x, params)
    jax.block_until_ready(out)

    # Pure-JAX reference mirroring the PyTorch forward exactly (three separate
    # point branches through the full fc21->fc24 chain, each summed over dim=1,
    # then added).
    w21, b21, w22, b22, w23, b23, w24, b24 = params

    def branch(p):                       # p: [B, C, 3]
        h = p @ w21.T + b21
        h = h @ w22.T + b22
        h = h @ w23.T + b23
        h = h @ w24.T + b24
        return h.sum(axis=1)

    ref = (branch(x[:, :, 0, :3])
           + branch(x[:, :, 1, :3])
           + branch(x[:, :, 2, :3]))

    assert out.shape == (B, 3)
    assert jnp.allclose(out, ref, atol=1e-3, rtol=1e-3), "mismatch vs reference"

    print("KERNEL_OK")
</pallas_src>

<mosaic_0001>
module attributes {stable_mosaic.version = 11 : i64} {
  func.func @_point_affine_kernel(%arg0: i32, %arg1: memref<3x36x128xf32, #tpu.memory_space<vmem>>, %arg2: memref<3x3xf32, #tpu.memory_space<vmem>>, %arg3: memref<3x1xf32, #tpu.memory_space<vmem>>, %arg4: memref<3x128xf32, #tpu.memory_space<vmem>>) attributes {dimension_semantics = [#tpu.dimension_semantics<parallel>], iteration_bounds = array<i64: 1>, scalar_prefetch = 0 : i64, scratch_operands = 0 : i64, tpu.core_type = #tpu.core_type<tc>, window_params = [{transform_indices = @transform_0, window_bounds = array<i64: 3, 36, 128>}, {pipeline_mode = #tpu.pipeline_mode<synchronous>, transform_indices = @transform_1, window_bounds = array<i64: 3, 3>}, {pipeline_mode = #tpu.pipeline_mode<synchronous>, transform_indices = @transform_2, window_bounds = array<i64: 3, 1>}, {transform_indices = @transform_3, window_bounds = array<i64: 3, 128>}]} {
    %c0 = arith.constant 0 : index
    %c0_0 = arith.constant 0 : index
    %c0_1 = arith.constant 0 : index
    %0 = vector.load %arg1[%c0, %c0_0, %c0_1] : memref<3x36x128xf32, #tpu.memory_space<vmem>>, vector<3x36x128xf32>
    %cst = arith.constant dense<0.000000e+00> : vector<3x128xf32>
    %1 = vector.multi_reduction <add>, %0, %cst [1] : vector<3x36x128xf32> to vector<3x128xf32>
    %c0_2 = arith.constant 0 : index
    %c0_3 = arith.constant 0 : index
    %2 = vector.load %arg2[%c0_2, %c0_3] : memref<3x3xf32, #tpu.memory_space<vmem>>, vector<3x3xf32>
    %cst_4 = arith.constant dense<0.000000e+00> : vector<3x128xf32>
    %3 = tpu.matmul %2, %1, %cst_4 {dimension_numbers = #tpu.dot_dimension_numbers<[1], [0], [0], [1], [0, 0, 1, 1], [], []>} : vector<3x3xf32>, vector<3x128xf32>, vector<3x128xf32> -> vector<3x128xf32>
    %c0_5 = arith.constant 0 : index
    %c0_6 = arith.constant 0 : index
    %4 = vector.load %arg3[%c0_5, %c0_6] : memref<3x1xf32, #tpu.memory_space<vmem>>, vector<3x1xf32>
    %5 = vector.broadcast %4 : vector<3x1xf32> to vector<3x128xf32>
    %6 = arith.addf %3, %5 : vector<3x128xf32>
    %c0_7 = arith.constant 0 : index
    %c0_8 = arith.constant 0 : index
    %7 = vector.load %arg4[%c0_7, %c0_8] : memref<3x128xf32, #tpu.memory_space<vmem>>, vector<3x128xf32>
    tpu.vector_store %arg4[%c0_7, %c0_8], %6 {strides = array<i32>} : memref<3x128xf32, #tpu.memory_space<vmem>>, vector<3x128xf32>,
    return
  }
  func.func @transform_0(%arg0: i32) -> (i32, i32, i32) {
    %c0_i32 = arith.constant 0 : i32
    %c0_i32_0 = arith.constant 0 : i32
    %c0_i32_1 = arith.constant 0 : i32
    return %c0_i32, %c0_i32_0, %arg0 : i32, i32, i32
  }
  func.func @transform_1(%arg0: i32) -> (i32, i32) {
    %c0_i32 = arith.constant 0 : i32
    %c0_i32_0 = arith.constant 0 : i32
    %c0_i32_1 = arith.constant 0 : i32
    return %c0_i32, %c0_i32_0 : i32, i32
  }
  func.func @transform_2(%arg0: i32) -> (i32, i32) {
    %c0_i32 = arith.constant 0 : i32
    %c0_i32_0 = arith.constant 0 : i32
    %c0_i32_1 = arith.constant 0 : i32
    return %c0_i32, %c0_i32_0 : i32, i32
  }
  func.func @transform_3(%arg0: i32) -> (i32, i32) {
    %c0_i32 = arith.constant 0 : i32
    %c0_i32_0 = arith.constant 0 : i32
    return %c0_i32, %arg0 : i32, i32
  }
}

</mosaic_0001>

<bundles_post_ra>
// kernel: tpu_custom_call.1
= control target key start
LH: loop header
LB: loop body
LE: loop exit
PB: predicated region body
PF: predicated region fallthrough
CT: control target
= control target key end

     0   :  { %8 = vsyncpa [#allocation3], 0  ;;  %s288_s0 = inlined_call_operand.hbm [shape: f32[3,36,128], index: 0, kind: input, shape index: {}]   ;;  %s289_s1 = inlined_call_operand.vmem [shape: f32[3,3], index: 1, kind: input, shape index: {}]   ;;  %s290_s2 = inlined_call_operand.vmem [shape: f32[3,1], index: 2, kind: input, shape index: {}]   ;;  %s291_s3 = inlined_call_operand.hbm [shape: f32[3,128], index: 3, kind: output, shape index: {}]  }
   0x1   :  { %9 = vsyncpa [#allocation4], 0  ;;  %s246_s12 = smov [#allocation2]  }
   0x2   :  { %s15_s13 = sshll.u32 %s246_s12, 4  ;;  %s16_s13 = int_to_ptr.vmem [resolvable:$true] %s15_s13 }
   0x3   :  { %s210_s14 = scalar_lea.vmem %s16_s13, 1920  ;;  %p215_p1 = scmp.lt.s32.totalorder %s16_s13, %s16_s13 }
   0x4   :  { %p211_p0 = scmp.ne.s32.totalorder %s16_s13, %s210_s14  ;;  %p216_p2 = scmp.lt.s32.totalorder %s210_s14, %s210_s14 }
   0x6   :  { %p217_p3 = por %p216_p2, %p215_p1 }
   0x8   :  { %p218_p4 = pnand %p217_p3, %p211_p0 }
   0xa   :  { %221 = shalt.err (!%p218_p4)
}
   0xb   :  { %s247_s15 = smov 128   ;;  %s248_s16 = smov 8  }
   0xc   :  { %21 = dma.hbm_to_vmem [thread:$0]  %s288_s0, 1920, %s16_s13, [#allocation3], %s247_s15, %s247_s15, %s248_s16  }
   0xd   :  { %242 = dma.done.wait [#allocation3], 1920  }
   0xe   :  { %243 = vsyncadd [#allocation3], 4294965376  ;;  %v249_v0 = vmov 0.0   ;;  %vm250_vm0 = vmmov 0   ;;  %v251_v1 = vmov 0   ;;  %v29_v2 = vld [vmem:[#allocation2] sm:$0xff] }
   0xf   :  { %189 = vmatprep.subr.mxu0 %v249_v0  ;;  %191 = vmatprep.mubr.msk.f32.mxu0 %vm250_vm0, %v249_v0  ;;  %v30_v3 = vld [vmem:[#allocation2 + $0x8] sm:$0xff]  ;;  %v31_v4 = vld [vmem:[#allocation2 + $0x10] sm:$0xff]  ;;  %v33_v5 = vld [vmem:[#allocation2 + $0x20] sm:$0xf]  ;;  %vm47_vm1 = vcmask 1043456   ;;  %vm88_vm2 = vcmask 1041409  }
  0x10   :  { %201 = vset.pattern.permute.xlu0 %v251_v1  ;;  %v34_v6 = vld [vmem:[#allocation2 + $0x28] sm:$0xff]  ;;  %v44_v7 = vadd.f32 %v30_v3, %v29_v2  ;;  %v32_v8 = vld [vmem:[#allocation2 + $0x18] sm:$0xff]  ;;  %v35_v9 = vld [vmem:[#allocation2 + $0x30] sm:$0xff]  ;;  %v48_v19 = vsel %vm47_vm1, %v33_v5, 0.0  ;;  %vm90_vm3 = vcmask 1042434   ;;  %vm96_vm4 = vcmask 1042432  }
  0x11   :  { %v36_v10 = vld [vmem:[#allocation2 + $0x38] sm:$0xff]  ;;  %v38_v11 = vld [vmem:[#allocation2 + $0x48] sm:$0xf]  ;;  %v39_v12 = vld [vmem:[#allocation2 + $0x50] sm:$0xff]  ;;  %v56_v15 = vadd.f32 %v35_v9, %v34_v6  ;;  %vm92_vm5 = vcmask 23552   ;;  %s252_s21 = smov [#allocation5]  }
  0x12   :  { %v40_v13 = vld [vmem:[#allocation2 + $0x58] sm:$0xff]  ;;  %v45_v14 = vadd.f32 %v44_v7, %v31_v4  ;;  %v37_v16 = vld [vmem:[#allocation2 + $0x40] sm:$0xff]  ;;  %v43_v18 = vld [vmem:[#allocation2 + $0x70] sm:$0xf]  ;;  %v59_v25 = vsel %vm47_vm1, %v38_v11, 0.0  ;;  %s176_s22 = sshll.u32 %s252_s21, 4  ;;  %s177_s22 = int_to_ptr.vmem [resolvable:$true] %s176_s22 }
  0x13   :  { %v41_v17 = vld [vmem:[#allocation2 + $0x60] sm:$0xff]  ;;  %v67_v20 = vadd.f32 %v40_v13, %v39_v12  ;;  %v42_v21 = vld [vmem:[#allocation2 + $0x68] sm:$0xff]  ;;  %v57_v23 = vadd.f32 %v56_v15, %v36_v10  ;;  %v70_v29 = vsel %vm47_vm1, %v43_v18, 0.0  ;;  %s222_s23 = scalar_lea.vmem %s177_s22, 64  ;;  %p227_p6 = scmp.lt.s32.totalorder %s177_s22, %s177_s22 }
  0x14   :  { %v46_v22 = vadd.f32 %v45_v14, %v32_v8  ;;  %v79_v24 = vld [vmem:[%s290_s2] sm:$0x7]  ;;  %p223_p5 = scmp.ne.s32.totalorder %s177_s22, %s222_s23  ;;  %p228_p7 = scmp.lt.s32.totalorder %s222_s23, %s222_s23 }
  0x15   :  { %v68_v26 = vadd.f32 %v67_v20, %v41_v17  ;;  %82 = vperm.xlu0 %201, %v79_v24   ;;  %v58_v28 = vadd.f32 %v57_v23, %v37_v16  ;;  %v78_v52 = vld [vmem:[%s289_s1] sm:$0x7] }
  0x16   :  { %v49_v27 = vadd.f32 %v48_v19, %v46_v22  ;;  %p229_p8 = por %p228_p7, %p227_p6 }
  0x17   :  { %v69_v30 = vadd.f32 %v68_v26, %v42_v21  ;;  %v60_v32 = vadd.f32 %v59_v25, %v58_v28 }
  0x18   :  { %v50_v31 = vrot.slane %v49_v27, 4  ;;  %p230_p9 = pnand %p229_p8, %p223_p5 }
  0x19   :  { %v71_v33 = vadd.f32 %v70_v29, %v69_v30  ;;  %v61_v35 = vrot.slane %v60_v32, 4 }
  0x1a   :  { %v51_v34 = vadd.f32 %v50_v31, %v49_v27 }
  0x1b   :  { %v72_v36 = vrot.slane %v71_v33, 4  ;;  %v62_v38 = vadd.f32 %v61_v35, %v60_v32 }
  0x1c   :  { %v52_v37 = vrot.slane %v51_v34, 2 }
  0x1d   :  { %v73_v39 = vadd.f32 %v72_v36, %v71_v33  ;;  %v63_v41 = vrot.slane %v62_v38, 2 }
  0x1e   :  { %v53_v40 = vadd.f32 %v52_v37, %v51_v34 }
  0x1f   :  { %v74_v42 = vrot.slane %v73_v39, 2  ;;  %v64_v44 = vadd.f32 %v63_v41, %v62_v38 }
  0x20   :  { %v54_v43 = vrot.slane %v53_v40, 1 }
  0x21   :  { %v75_v45 = vadd.f32 %v74_v42, %v73_v39  ;;  %v65_v47 = vrot.slane %v64_v44, 1 }
  0x22   :  { %v55_v46 = vadd.f32 %v54_v43, %v53_v40 }
  0x23   :  { %v76_v48 = vrot.slane %v75_v45, 1  ;;  %v66_v49 = vadd.f32 %v65_v47, %v64_v44 }
  0x25   :  { %v77_v50 = vadd.f32 %v76_v48, %v75_v45  ;;  %v89_v51 = vsel %vm88_vm2, %v66_v49, %v55_v46 }
  0x27   :  { %v91_v53 = vsel %vm90_vm3, %v77_v50, %v89_v51 }
  0x28   :  { %190 = vmatpush3.msk.msra.mxu0 %vm96_vm4, %v91_v53 }
  0x29   :  { %192 = vmatmul.mubr.msk.f32.vlgmr.msra.gmra.mxu0 %vm92_vm5, %v78_v52 }
  0x90   :  { %v83_v54 = vpop.permute.xlu0 %82 }
  0xe9   :  { %v165_v55 = vpop.f32.mrf.mxu0 }
  0xea   :  { %v166_v56 = vadd.f32 %v165_v55, %v83_v54 }
  0xeb   :  { %v193_v57 = vpop.f32.mrf.mxu0 }
  0xec   :  { %169 = vst [vmem:[#allocation5] sm:$0x7] %v166_v56 }
  0xed   :  { %233 = shalt.err (!%p230_p9)
}
  0xee   :  { %179 = dma.vmem_to_hbm [thread:$0]  %s177_s22, 64, %s291_s3, [#allocation4]  }
  0xef   :  { %244 = dma.done.wait [#allocation4], 64  }
  0xf0   :  { %245 = vsyncadd [#allocation4], 4294967232 }
  0xf1   :  { %183 = vsyncpa [#allocation3], 1 }
  0xf2   :  { %184 = vsyncpa [#allocation4], 1 }

</bundles_post_ra>
